<compile_context>
chip_gen: v7x
topology: tpu7x:2x2x1
jax: 0.10.0
libtpu: 0.0.40
codegen_flags: <defaults>
</compile_context>

<pallas_src>
import functools

import jax
import jax.numpy as jnp
from jax.experimental import pallas as pl
from jax.experimental.pallas import tpu as pltpu


# Tap order t = (kh*3 + kw), i.e. (dh, dw) with dh = kh-1, dw = kw-1.
_TAPS = tuple((dh, dw) for dh in (-1, 0, 1) for dw in (-1, 0, 1))


def _residual_block_kernel(x_ref, w1_ref, b1_ref, w2_ref, b2_ref, o_ref,
                           *, H, W, C, n_imgs):
    """One grid step processes n_imgs images as a single (C, n_imgs*H*W) slab.

    x_ref / o_ref : (C, n_imgs*H*W)   lane-dense slab, batch on the lane axis
    w*_ref        : (C, 9*C)          (Cout, 9*Cin), tap-major along axis 1
    b*_ref        : (C, 1)
    """
    HW = H * W
    L = n_imgs * HW

    # ---- border masks from a lane-axis iota (computed once per grid step).
    # Within-image coords use q = pos mod HW, so the masks repeat per image
    # and also zero every position where a roll would pull pixels across an
    # image boundary (those destinations are exactly the SAME-padding border).
    pos = jax.lax.broadcasted_iota(jnp.int32, (1, L), 1)
    if HW & (HW - 1) == 0:                       # power-of-two fast path
        q = jnp.bitwise_and(pos, HW - 1)
    else:
        q = pos % HW
    if W & (W - 1) == 0:
        hh = jnp.right_shift(q, W.bit_length() - 1)
        ww = jnp.bitwise_and(q, W - 1)
    else:
        hh = q // W
        ww = q - (q // W) * W

    masks = []
    for dh, dw in _TAPS:
        conds = []
        if dh == -1:
            conds.append(hh >= 1)
        elif dh == 1:
            conds.append(hh <= H - 2)
        if dw == -1:
            conds.append(ww >= 1)
        elif dw == 1:
            conds.append(ww <= W - 2)
        if conds:
            valid = conds[0]
            for cnd in conds[1:]:
                valid = jnp.logical_and(valid, cnd)
            masks.append(valid.astype(jnp.float32))   # (1, L)
        else:
            masks.append(None)                        # center tap

    # Loop-invariant loads, once per grid step.
    w1 = w1_ref[...]   # (C, 9C)
    w2 = w2_ref[...]   # (C, 9C)
    b1 = b1_ref[...]   # (C, 1)
    b2 = b2_ref[...]   # (C, 1)

    def conv3x3(img, w2d, b_col):
        """img: (C, L) f32 -> SAME conv output (C, L) f32, bias included."""
        taps = []
        for t, (dh, dw) in enumerate(_TAPS):
            s = dh * W + dw                       # flat source-pixel offset
            if s == 0:
                shifted = img
            else:
                shifted = pltpu.roll(img, shift=(-s) % L, axis=1)   # XLU slot
            if masks[t] is not None:
                shifted = shifted * masks[t]
            taps.append(shifted)
        stacked = jnp.concatenate(taps, axis=0)   # (9*C, L) on sublanes
        # Single (Cout, 9*Cin) @ (9*Cin, L) contraction: lane-dense MXU output.
        return jnp.dot(w2d, stacked, preferred_element_type=jnp.float32) + b_col

    x = x_ref[...].astype(jnp.float32)                 # (C, L)
    h = conv3x3(jnp.maximum(x, 0.0), w1, b1)           # conv1(relu(x))
    h = conv3x3(jnp.maximum(h, 0.0), w2, b2)           # conv2(relu(.))
    o_ref[...] = (h + x).astype(o_ref.dtype)           # residual add


def _pick_images_per_block(n, c, hw, itemsize, per_block_budget_bytes=4 << 20):
    """Largest divisor nb of n whose (C, nb*HW) block fits the budget.

    No minimum grid-step count (single-TC chips pay ~600 cycles per extra
    step; for tiny batches one fat step also wins on v7x).  Budget keeps the
    double-buffered 2x(in + out) blocks ~= 4x this value, comfortably under
    v7x's 32 MiB scoped-VMEM default.  Lane dim of the block must stay a
    multiple of 128 unless it spans the full array.
    """
    candidates = [nb for nb in range(1, n + 1)
                  if n % nb == 0 and ((nb * hw) % 128 == 0 or nb == n)]
    in_budget = [nb for nb in candidates
                 if nb * c * hw * itemsize <= per_block_budget_bytes]
    return max(in_budget) if in_budget else min(candidates)


@jax.jit
def residual_block_nchw(x_nchw, w1, b1, w2, b2):
    """x_nchw: (N, C, H, W) f32.  w*: (3, 3, Cin, Cout) [HWIO], b*: (C,)."""
    N, C, H, W = x_nchw.shape
    HW = H * W

    # Lane-dense slab with the whole batch on the lane axis: (C, N*H*W).
    x_slab = jnp.transpose(x_nchw, (1, 0, 2, 3)).reshape(C, N * HW)

    # (Cout, 9*Cin) with tap-major ordering t = kh*3 + kw — matches the
    # in-kernel concatenation order (row index = t*Cin + ci).
    w1_2d = jnp.transpose(w1, (3, 0, 1, 2)).reshape(C, 9 * C)
    w2_2d = jnp.transpose(w2, (3, 0, 1, 2)).reshape(C, 9 * C)
    b1_c = b1.reshape(C, 1)
    b2_c = b2.reshape(C, 1)

    nb = _pick_images_per_block(N, C, HW, x_slab.dtype.itemsize)
    grid = (N // nb,)

    kernel = functools.partial(_residual_block_kernel,
                               H=H, W=W, C=C, n_imgs=nb)

    out = pl.pallas_call(
        kernel,
        out_shape=jax.ShapeDtypeStruct((C, N * HW), x_slab.dtype),
        grid_spec=pltpu.PrefetchScalarGridSpec(
            num_scalar_prefetch=0,
            grid=grid,
            in_specs=[
                pl.BlockSpec((C, nb * HW), lambda n: (0, n)),
                pl.BlockSpec((C, 9 * C), lambda n: (0, 0)),
                pl.BlockSpec((C, 1), lambda n: (0, 0)),
                pl.BlockSpec((C, 9 * C), lambda n: (0, 0)),
                pl.BlockSpec((C, 1), lambda n: (0, 0)),
            ],
            out_specs=pl.BlockSpec((C, nb * HW), lambda n: (0, n)),
        ),
        compiler_params=pltpu.CompilerParams(
            dimension_semantics=("parallel",)),
    )(x_slab, w1_2d, b1_c, w2_2d, b2_c)

    return jnp.transpose(out.reshape(C, N, H, W), (1, 0, 2, 3))


def _reference_residual_block(x_nchw, w1, b1, w2, b2):
    """Pure-JAX reference (lax conv) for correctness checking."""
    def conv(inp, w, b):
        out = jax.lax.conv_general_dilated(
            inp, w, window_strides=(1, 1), padding="SAME",
            dimension_numbers=("NCHW", "HWIO", "NCHW"))
        return out + b.reshape(1, -1, 1, 1)

    out = jax.nn.relu(x_nchw)
    out = conv(out, w1, b1)
    out = jax.nn.relu(out)
    out = conv(out, w2, b2)
    return out + x_nchw


if __name__ == "__main__":
    depth = 4          # channels
    N, H, W = 2, 16, 16

    key = jax.random.PRNGKey(0)
    kx, k1, k2, k3, k4 = jax.random.split(key, 5)

    x = jax.random.normal(kx, (N, depth, H, W), dtype=jnp.float32)
    # Deterministic synthetic weights (Conv2d(depth, depth, 3) shapes, stored
    # HWIO = (kh, kw, Cin, Cout)); scaled roughly like kaiming-uniform.
    scale = 1.0 / jnp.sqrt(depth * 9.0)
    w1 = jax.random.normal(k1, (3, 3, depth, depth), jnp.float32) * scale
    b1 = jax.random.normal(k2, (depth,), jnp.float32) * scale
    w2 = jax.random.normal(k3, (3, 3, depth, depth), jnp.float32) * scale
    b2 = jax.random.normal(k4, (depth,), jnp.float32) * scale

    out = residual_block_nchw(x, w1, b1, w2, b2)
    out = jax.block_until_ready(out)

    ref = _reference_residual_block(x, w1, b1, w2, b2)
    assert out.shape == (N, depth, H, W)
    assert jnp.allclose(out, ref, atol=1e-4, rtol=1e-4), "mismatch vs reference"

    print("KERNEL_OK")
</pallas_src>

<mosaic_0001>
module attributes {stable_mosaic.version = 11 : i64} {
  func.func @_residual_block_kernel(%arg0: i32, %arg1: memref<4x512xf32, #tpu.memory_space<vmem>>, %arg2: memref<4x36xf32, #tpu.memory_space<vmem>>, %arg3: memref<4x1xf32, #tpu.memory_space<vmem>>, %arg4: memref<4x36xf32, #tpu.memory_space<vmem>>, %arg5: memref<4x1xf32, #tpu.memory_space<vmem>>, %arg6: memref<4x512xf32, #tpu.memory_space<vmem>>) attributes {dimension_semantics = [#tpu.dimension_semantics<parallel>], iteration_bounds = array<i64: 1>, scalar_prefetch = 0 : i64, scratch_operands = 0 : i64, tpu.core_type = #tpu.core_type<tc>, window_params = [{transform_indices = @transform_0, window_bounds = array<i64: 4, 512>}, {pipeline_mode = #tpu.pipeline_mode<synchronous>, transform_indices = @transform_1, window_bounds = array<i64: 4, 36>}, {pipeline_mode = #tpu.pipeline_mode<synchronous>, transform_indices = @transform_2, window_bounds = array<i64: 4, 1>}, {pipeline_mode = #tpu.pipeline_mode<synchronous>, transform_indices = @transform_3, window_bounds = array<i64: 4, 36>}, {pipeline_mode = #tpu.pipeline_mode<synchronous>, transform_indices = @transform_4, window_bounds = array<i64: 4, 1>}, {transform_indices = @transform_5, window_bounds = array<i64: 4, 512>}]} {
    %0 = tpu.iota {dimensions = array<i32: 1>} : vector<1x512xi32>
    %c255_i32 = arith.constant 255 : i32
    %1 = vector.broadcast %c255_i32 : i32 to vector<1x512xi32>
    %2 = arith.andi %0, %1 : vector<1x512xi32>
    %c4_i32 = arith.constant 4 : i32
    %3 = vector.broadcast %c4_i32 : i32 to vector<1x512xi32>
    %4 = arith.shrsi %2, %3 : vector<1x512xi32>
    %c15_i32 = arith.constant 15 : i32
    %5 = vector.broadcast %c15_i32 : i32 to vector<1x512xi32>
    %6 = arith.andi %2, %5 : vector<1x512xi32>
    %c1_i32 = arith.constant 1 : i32
    %7 = vector.broadcast %c1_i32 : i32 to vector<1x512xi32>
    %8 = arith.cmpi sge, %4, %7 : vector<1x512xi32>
    %c1_i32_0 = arith.constant 1 : i32
    %9 = vector.broadcast %c1_i32_0 : i32 to vector<1x512xi32>
    %10 = arith.cmpi sge, %6, %9 : vector<1x512xi32>
    %11 = arith.andi %8, %10 : vector<1x512xi1>
    %12 = arith.extui %11 : vector<1x512xi1> to vector<1x512xi32>
    %13 = arith.sitofp %12 : vector<1x512xi32> to vector<1x512xf32>
    %c1_i32_1 = arith.constant 1 : i32
    %14 = vector.broadcast %c1_i32_1 : i32 to vector<1x512xi32>
    %15 = arith.cmpi sge, %4, %14 : vector<1x512xi32>
    %16 = arith.extui %15 : vector<1x512xi1> to vector<1x512xi32>
    %17 = arith.sitofp %16 : vector<1x512xi32> to vector<1x512xf32>
    %c1_i32_2 = arith.constant 1 : i32
    %18 = vector.broadcast %c1_i32_2 : i32 to vector<1x512xi32>
    %19 = arith.cmpi sge, %4, %18 : vector<1x512xi32>
    %c14_i32 = arith.constant 14 : i32
    %20 = vector.broadcast %c14_i32 : i32 to vector<1x512xi32>
    %21 = arith.cmpi sle, %6, %20 : vector<1x512xi32>
    %22 = arith.andi %19, %21 : vector<1x512xi1>
    %23 = arith.extui %22 : vector<1x512xi1> to vector<1x512xi32>
    %24 = arith.sitofp %23 : vector<1x512xi32> to vector<1x512xf32>
    %c1_i32_3 = arith.constant 1 : i32
    %25 = vector.broadcast %c1_i32_3 : i32 to vector<1x512xi32>
    %26 = arith.cmpi sge, %6, %25 : vector<1x512xi32>
    %27 = arith.extui %26 : vector<1x512xi1> to vector<1x512xi32>
    %28 = arith.sitofp %27 : vector<1x512xi32> to vector<1x512xf32>
    %c14_i32_4 = arith.constant 14 : i32
    %29 = vector.broadcast %c14_i32_4 : i32 to vector<1x512xi32>
    %30 = arith.cmpi sle, %6, %29 : vector<1x512xi32>
    %31 = arith.extui %30 : vector<1x512xi1> to vector<1x512xi32>
    %32 = arith.sitofp %31 : vector<1x512xi32> to vector<1x512xf32>
    %c14_i32_5 = arith.constant 14 : i32
    %33 = vector.broadcast %c14_i32_5 : i32 to vector<1x512xi32>
    %34 = arith.cmpi sle, %4, %33 : vector<1x512xi32>
    %c1_i32_6 = arith.constant 1 : i32
    %35 = vector.broadcast %c1_i32_6 : i32 to vector<1x512xi32>
    %36 = arith.cmpi sge, %6, %35 : vector<1x512xi32>
    %37 = arith.andi %34, %36 : vector<1x512xi1>
    %38 = arith.extui %37 : vector<1x512xi1> to vector<1x512xi32>
    %39 = arith.sitofp %38 : vector<1x512xi32> to vector<1x512xf32>
    %c14_i32_7 = arith.constant 14 : i32
    %40 = vector.broadcast %c14_i32_7 : i32 to vector<1x512xi32>
    %41 = arith.cmpi sle, %4, %40 : vector<1x512xi32>
    %42 = arith.extui %41 : vector<1x512xi1> to vector<1x512xi32>
    %43 = arith.sitofp %42 : vector<1x512xi32> to vector<1x512xf32>
    %c14_i32_8 = arith.constant 14 : i32
    %44 = vector.broadcast %c14_i32_8 : i32 to vector<1x512xi32>
    %45 = arith.cmpi sle, %4, %44 : vector<1x512xi32>
    %c14_i32_9 = arith.constant 14 : i32
    %46 = vector.broadcast %c14_i32_9 : i32 to vector<1x512xi32>
    %47 = arith.cmpi sle, %6, %46 : vector<1x512xi32>
    %48 = arith.andi %45, %47 : vector<1x512xi1>
    %49 = arith.extui %48 : vector<1x512xi1> to vector<1x512xi32>
    %50 = arith.sitofp %49 : vector<1x512xi32> to vector<1x512xf32>
    %c0 = arith.constant 0 : index
    %c0_10 = arith.constant 0 : index
    %51 = vector.load %arg2[%c0, %c0_10] : memref<4x36xf32, #tpu.memory_space<vmem>>, vector<4x36xf32>
    %c0_11 = arith.constant 0 : index
    %c0_12 = arith.constant 0 : index
    %52 = vector.load %arg4[%c0_11, %c0_12] : memref<4x36xf32, #tpu.memory_space<vmem>>, vector<4x36xf32>
    %c0_13 = arith.constant 0 : index
    %c0_14 = arith.constant 0 : index
    %53 = vector.load %arg3[%c0_13, %c0_14] : memref<4x1xf32, #tpu.memory_space<vmem>>, vector<4x1xf32>
    %c0_15 = arith.constant 0 : index
    %c0_16 = arith.constant 0 : index
    %54 = vector.load %arg5[%c0_15, %c0_16] : memref<4x1xf32, #tpu.memory_space<vmem>>, vector<4x1xf32>
    %c0_17 = arith.constant 0 : index
    %c0_18 = arith.constant 0 : index
    %55 = vector.load %arg1[%c0_17, %c0_18] : memref<4x512xf32, #tpu.memory_space<vmem>>, vector<4x512xf32>
    %cst = arith.constant 0.000000e+00 : f32
    %56 = vector.broadcast %cst : f32 to vector<4x512xf32>
    %57 = arith.maximumf %55, %56 : vector<4x512xf32>
    %c17_i32 = arith.constant 17 : i32
    %58 = tpu.dynamic_rotate %57 by %c17_i32 dim 1 : vector<4x512xf32>, i32 -> vector<4x512xf32>
    %59 = vector.broadcast %13 : vector<1x512xf32> to vector<4x512xf32>
    %60 = arith.mulf %58, %59 : vector<4x512xf32>
    %c16_i32 = arith.constant 16 : i32
    %61 = tpu.dynamic_rotate %57 by %c16_i32 dim 1 : vector<4x512xf32>, i32 -> vector<4x512xf32>
    %62 = vector.broadcast %17 : vector<1x512xf32> to vector<4x512xf32>
    %63 = arith.mulf %61, %62 : vector<4x512xf32>
    %c15_i32_19 = arith.constant 15 : i32
    %64 = tpu.dynamic_rotate %57 by %c15_i32_19 dim 1 : vector<4x512xf32>, i32 -> vector<4x512xf32>
    %65 = vector.broadcast %24 : vector<1x512xf32> to vector<4x512xf32>
    %66 = arith.mulf %64, %65 : vector<4x512xf32>
    %c1_i32_20 = arith.constant 1 : i32
    %67 = tpu.dynamic_rotate %57 by %c1_i32_20 dim 1 : vector<4x512xf32>, i32 -> vector<4x512xf32>
    %68 = vector.broadcast %28 : vector<1x512xf32> to vector<4x512xf32>
    %69 = arith.mulf %67, %68 : vector<4x512xf32>
    %c511_i32 = arith.constant 511 : i32
    %70 = tpu.dynamic_rotate %57 by %c511_i32 dim 1 : vector<4x512xf32>, i32 -> vector<4x512xf32>
    %71 = vector.broadcast %32 : vector<1x512xf32> to vector<4x512xf32>
    %72 = arith.mulf %70, %71 : vector<4x512xf32>
    %c497_i32 = arith.constant 497 : i32
    %73 = tpu.dynamic_rotate %57 by %c497_i32 dim 1 : vector<4x512xf32>, i32 -> vector<4x512xf32>
    %74 = vector.broadcast %39 : vector<1x512xf32> to vector<4x512xf32>
    %75 = arith.mulf %73, %74 : vector<4x512xf32>
    %c496_i32 = arith.constant 496 : i32
    %76 = tpu.dynamic_rotate %57 by %c496_i32 dim 1 : vector<4x512xf32>, i32 -> vector<4x512xf32>
    %77 = vector.broadcast %43 : vector<1x512xf32> to vector<4x512xf32>
    %78 = arith.mulf %76, %77 : vector<4x512xf32>
    %c495_i32 = arith.constant 495 : i32
    %79 = tpu.dynamic_rotate %57 by %c495_i32 dim 1 : vector<4x512xf32>, i32 -> vector<4x512xf32>
    %80 = vector.broadcast %50 : vector<1x512xf32> to vector<4x512xf32>
    %81 = arith.mulf %79, %80 : vector<4x512xf32>
    %82 = tpu.concatenate %60, %63, %66, %69, %57, %72, %75, %78, %81 in 0 : vector<4x512xf32>, vector<4x512xf32>, vector<4x512xf32>, vector<4x512xf32>, vector<4x512xf32>, vector<4x512xf32>, vector<4x512xf32>, vector<4x512xf32>, vector<4x512xf32> -> vector<36x512xf32>
    %cst_21 = arith.constant dense<0.000000e+00> : vector<4x512xf32>
    %83 = tpu.matmul %51, %82, %cst_21 {dimension_numbers = #tpu.dot_dimension_numbers<[1], [0], [0], [1], [0, 0, 1, 1], [], []>} : vector<4x36xf32>, vector<36x512xf32>, vector<4x512xf32> -> vector<4x512xf32>
    %84 = vector.broadcast %53 : vector<4x1xf32> to vector<4x512xf32>
    %85 = arith.addf %83, %84 : vector<4x512xf32>
    %cst_22 = arith.constant 0.000000e+00 : f32
    %86 = vector.broadcast %cst_22 : f32 to vector<4x512xf32>
    %87 = arith.maximumf %85, %86 : vector<4x512xf32>
    %c17_i32_23 = arith.constant 17 : i32
    %88 = tpu.dynamic_rotate %87 by %c17_i32_23 dim 1 : vector<4x512xf32>, i32 -> vector<4x512xf32>
    %89 = vector.broadcast %13 : vector<1x512xf32> to vector<4x512xf32>
    %90 = arith.mulf %88, %89 : vector<4x512xf32>
    %c16_i32_24 = arith.constant 16 : i32
    %91 = tpu.dynamic_rotate %87 by %c16_i32_24 dim 1 : vector<4x512xf32>, i32 -> vector<4x512xf32>
    %92 = vector.broadcast %17 : vector<1x512xf32> to vector<4x512xf32>
    %93 = arith.mulf %91, %92 : vector<4x512xf32>
    %c15_i32_25 = arith.constant 15 : i32
    %94 = tpu.dynamic_rotate %87 by %c15_i32_25 dim 1 : vector<4x512xf32>, i32 -> vector<4x512xf32>
    %95 = vector.broadcast %24 : vector<1x512xf32> to vector<4x512xf32>
    %96 = arith.mulf %94, %95 : vector<4x512xf32>
    %c1_i32_26 = arith.constant 1 : i32
    %97 = tpu.dynamic_rotate %87 by %c1_i32_26 dim 1 : vector<4x512xf32>, i32 -> vector<4x512xf32>
    %98 = vector.broadcast %28 : vector<1x512xf32> to vector<4x512xf32>
    %99 = arith.mulf %97, %98 : vector<4x512xf32>
    %c511_i32_27 = arith.constant 511 : i32
    %100 = tpu.dynamic_rotate %87 by %c511_i32_27 dim 1 : vector<4x512xf32>, i32 -> vector<4x512xf32>
    %101 = vector.broadcast %32 : vector<1x512xf32> to vector<4x512xf32>
    %102 = arith.mulf %100, %101 : vector<4x512xf32>
    %c497_i32_28 = arith.constant 497 : i32
    %103 = tpu.dynamic_rotate %87 by %c497_i32_28 dim 1 : vector<4x512xf32>, i32 -> vector<4x512xf32>
    %104 = vector.broadcast %39 : vector<1x512xf32> to vector<4x512xf32>
    %105 = arith.mulf %103, %104 : vector<4x512xf32>
    %c496_i32_29 = arith.constant 496 : i32
    %106 = tpu.dynamic_rotate %87 by %c496_i32_29 dim 1 : vector<4x512xf32>, i32 -> vector<4x512xf32>
    %107 = vector.broadcast %43 : vector<1x512xf32> to vector<4x512xf32>
    %108 = arith.mulf %106, %107 : vector<4x512xf32>
    %c495_i32_30 = arith.constant 495 : i32
    %109 = tpu.dynamic_rotate %87 by %c495_i32_30 dim 1 : vector<4x512xf32>, i32 -> vector<4x512xf32>
    %110 = vector.broadcast %50 : vector<1x512xf32> to vector<4x512xf32>
    %111 = arith.mulf %109, %110 : vector<4x512xf32>
    %112 = tpu.concatenate %90, %93, %96, %99, %87, %102, %105, %108, %111 in 0 : vector<4x512xf32>, vector<4x512xf32>, vector<4x512xf32>, vector<4x512xf32>, vector<4x512xf32>, vector<4x512xf32>, vector<4x512xf32>, vector<4x512xf32>, vector<4x512xf32> -> vector<36x512xf32>
    %cst_31 = arith.constant dense<0.000000e+00> : vector<4x512xf32>
    %113 = tpu.matmul %52, %112, %cst_31 {dimension_numbers = #tpu.dot_dimension_numbers<[1], [0], [0], [1], [0, 0, 1, 1], [], []>} : vector<4x36xf32>, vector<36x512xf32>, vector<4x512xf32> -> vector<4x512xf32>
    %114 = vector.broadcast %54 : vector<4x1xf32> to vector<4x512xf32>
    %115 = arith.addf %113, %114 : vector<4x512xf32>
    %116 = arith.addf %115, %55 : vector<4x512xf32>
    %c0_32 = arith.constant 0 : index
    %c0_33 = arith.constant 0 : index
    %117 = vector.load %arg6[%c0_32, %c0_33] : memref<4x512xf32, #tpu.memory_space<vmem>>, vector<4x512xf32>
    tpu.vector_store %arg6[%c0_32, %c0_33], %116 {strides = array<i32>} : memref<4x512xf32, #tpu.memory_space<vmem>>, vector<4x512xf32>,
    return
  }
  func.func @transform_0(%arg0: i32) -> (i32, i32) {
    %c0_i32 = arith.constant 0 : i32
    %c0_i32_0 = arith.constant 0 : i32
    return %c0_i32, %arg0 : i32, i32
  }
  func.func @transform_1(%arg0: i32) -> (i32, i32) {
    %c0_i32 = arith.constant 0 : i32
    %c0_i32_0 = arith.constant 0 : i32
    %c0_i32_1 = arith.constant 0 : i32
    return %c0_i32, %c0_i32_0 : i32, i32
  }
  func.func @transform_2(%arg0: i32) -> (i32, i32) {
    %c0_i32 = arith.constant 0 : i32
    %c0_i32_0 = arith.constant 0 : i32
    %c0_i32_1 = arith.constant 0 : i32
    return %c0_i32, %c0_i32_0 : i32, i32
  }
  func.func @transform_3(%arg0: i32) -> (i32, i32) {
    %c0_i32 = arith.constant 0 : i32
    %c0_i32_0 = arith.constant 0 : i32
    %c0_i32_1 = arith.constant 0 : i32
    return %c0_i32, %c0_i32_0 : i32, i32
  }
  func.func @transform_4(%arg0: i32) -> (i32, i32) {
    %c0_i32 = arith.constant 0 : i32
    %c0_i32_0 = arith.constant 0 : i32
    %c0_i32_1 = arith.constant 0 : i32
    return %c0_i32, %c0_i32_0 : i32, i32
  }
  func.func @transform_5(%arg0: i32) -> (i32, i32) {
    %c0_i32 = arith.constant 0 : i32
    %c0_i32_0 = arith.constant 0 : i32
    return %c0_i32, %arg0 : i32, i32
  }
}

</mosaic_0001>

<bundles_post_ra>
// kernel: residual_block_nchw.1
= control target key start
LH: loop header
LB: loop body
LE: loop exit
PB: predicated region body
PF: predicated region fallthrough
CT: control target
= control target key end

     0   :  { %v983_v2 = vmov 0.0   ;;  %s984_s22 = smov 16   ;;  %s985_s23 = smov 1   ;;  %v991_v7 = vmov 0   ;;  %v20_v9 = vlaneseq  ;;  %s1747_s0 = inlined_call_operand.vmem [shape: f32[4,512], index: 0, kind: input, shape index: {}]   ;;  %s1748_s2 = inlined_call_operand.vmem [shape: f32[4,1], index: 2, kind: input, shape index: {}]   ;;  %s1749_s1 = inlined_call_operand.vmem [shape: f32[4,36], index: 1, kind: input, shape index: {}]   ;;  %s1750_s4 = inlined_call_operand.vmem [shape: f32[4,1], index: 4, kind: input, shape index: {}]   ;;  %s1751_s3 = inlined_call_operand.vmem [shape: f32[4,36], index: 3, kind: input, shape index: {}]   ;;  %s1752_s5 = inlined_call_operand.vmem [shape: f32[4,512], index: 5, kind: output, shape index: {}]  }
   0x1   :  { %v1026_v0 = vld [vmem:[%s1747_s0 + $0x8] sm:$0xff]  ;;  %v1031_v1 = vld [vmem:[%s1747_s0] sm:$0xff]  ;;  %433 = vmatprep.mubr.f32.mxu0 %v983_v2  ;;  %504 = vmatprep.mubr.f32.mxu1 %v983_v2  ;;  %s986_s24 = smov 17   ;;  %s987_s25 = smov 15  }
   0x2   :  { %1764 = vst [vmem:[#allocation2_spill] sm:$0xff] %v1026_v0  ;;  %1765 = vst [vmem:[#allocation3_spill] sm:$0xff] %v1031_v1  ;;  %v1036_v3 = vmax.f32 %v1026_v0, 0.0  ;;  %v1039_v4 = vmax.f32 %v1031_v1, 0.0  ;;  %s988_s26 = smov 127   ;;  %s989_s27 = smov 112   ;;  %979 = vset.pattern.permute.xlu0 %v991_v7 }
   0x3   :  { %s990_s28 = smov 113   ;;  %s992_s29 = smov 111   ;;  %v135_v8 = vld [vmem:[%s1748_s2] sm:$0xf]  ;;  %v1116_v10 = vand.u32 127, %v20_v9 }
   0x4   :  { %168 = vrot.lane.b32.xlu1 %v1036_v3, %s984_s22  ;;  %164 = vrot.lane.b32.xlu0 %v1039_v4, %s984_s22  ;;  %v1047_v5 = vcombine.high %v1036_v3, %v1036_v3  ;;  %v1051_v6 = vcombine.high %v1039_v4, %v1039_v4 }
   0x5   :  { %v24_v13 = vadd.s32 384, %v1116_v10  ;;  %v22_v14 = vadd.s32 128, %v1116_v10  ;;  %v23_v15 = vadd.s32 256, %v1116_v10  ;;  %v25_v16 = vand.u32 255, %v1116_v10 }
   0x6   :  { %vm1759_vm2 = vcmp.lt.s32.totalorder %v1116_v10, 16  ;;  %vm1758_vm7 = vcmp.lt.s32.totalorder %v1116_v10, 1 }
   0x7   :  { %v28_v17 = vand.u32 255, %v24_v13  ;;  %v26_v20 = vand.u32 255, %v22_v14  ;;  %v27_v21 = vand.u32 255, %v23_v15  ;;  %v1124_v22 = vshra.s32 %v25_v16, 4 }
   0x8   :  { %170 = vrot.lane.b32.xlu1 %v1047_v5, %s984_s22  ;;  %166 = vrot.lane.b32.xlu0 %v1051_v6, %s984_s22  ;;  %v1128_v26 = vand.u32 15, %v25_v16 }
   0x9   :  { %v1126_v23 = vshra.s32 %v28_v17, 4  ;;  %v1130_v27 = vshra.s32 %v26_v20, 4  ;;  %v1132_v28 = vshra.s32 %v27_v21, 4  ;;  %v1134_v29 = vand.u32 15, %v26_v20 }
   0xa   :  { %v1136_v30 = vand.u32 15, %v27_v21  ;;  %v1138_v31 = vand.u32 15, %v28_v17  ;;  %vm37_vm0 = vcmp.ge.s32.totalorder %v1124_v22, 1  ;;  %vm1753_vm3 = vcmp.ge.s32.totalorder %v1128_v26, 1 }
   0xb   :  { %vm40_vm1 = vcmp.ge.s32.totalorder %v1126_v23, 1  ;;  %vm38_vm4 = vcmp.ge.s32.totalorder %v1130_v27, 1  ;;  %vm39_vm5 = vcmp.ge.s32.totalorder %v1132_v28, 1  ;;  %vm1754_vm6 = vcmp.ge.s32.totalorder %v1134_v29, 1  ;;  %vm1152_vm8 = vmand %vm37_vm0, %vm1753_vm3 }
   0xc   :  { %200 = vrot.lane.b32.xlu1 %v1051_v6, %s985_s23  ;;  %198 = vrot.lane.b32.xlu0 %v1039_v4, %s985_s23  ;;  %vm1755_vm9 = vcmp.ge.s32.totalorder %v1136_v30, 1  ;;  %vm44_vm10 = vcmp.ge.s32.totalorder %v1138_v31, 1  ;;  %vm1162_vm11 = vmand %vm38_vm4, %vm1754_vm6  ;;  %vm66_vm13 = vcmp.le.s32.totalorder %v1134_v29, 14  ;;  %v1171_v36 = vsel %vm37_vm0, 1.0, %v983_v2 }
   0xd   :  { %v1176_v37 = vsel %vm40_vm1, 1.0, %v983_v2  ;;  %v1181_v38 = vsel %vm1753_vm3, 1.0, %v983_v2  ;;  %vm1187_vm14 = vmand %vm39_vm5, %vm1755_vm9  ;;  %vm65_vm15 = vcmp.le.s32.totalorder %v1128_v26, 14  ;;  %v1195_v40 = vsel %vm38_vm4, 1.0, %v983_v2 }
   0xe   :  { %v1200_v41 = vsel %vm39_vm5, 1.0, %v983_v2  ;;  %v1205_v42 = vsel %vm1754_vm6, 1.0, %v983_v2  ;;  %vm48_vm3 = vmand %vm40_vm1, %vm44_vm10  ;;  %vm67_vm12 = vcmp.le.s32.totalorder %v1136_v30, 14  ;;  %v1215_v45 = vsel %vm1755_vm9, 1.0, %v983_v2 }
   0xf   :  { %v1220_v46 = vsel %vm44_vm10, 1.0, %v983_v2  ;;  %v1225_v47 = vsel %vm1162_vm11, 1.0, %v983_v2  ;;  %vm1231_vm6 = vmand %vm38_vm4, %vm66_vm13  ;;  %vm68_vm9 = vcmp.le.s32.totalorder %v1138_v31, 14  ;;  %v1244_v51 = vsel %vm1152_vm8, 1.0, %v983_v2 }
  0x10   :  { %204 = vrot.lane.b32.xlu1 %v1047_v5, %s985_s23  ;;  %202 = vrot.lane.b32.xlu0 %v1036_v3, %s985_s23  ;;  %v1249_v52 = vsel %vm1187_vm14, 1.0, %v983_v2  ;;  %vm1255_vm4 = vmand %vm37_vm0, %vm65_vm15  ;;  %v1264_v56 = vsel %vm48_vm3, 1.0, %v983_v2  ;;  %vm1756_vm8 = vcmp.lt.s32.totalorder %v1116_v10, 15  ;;  %v1279_v61 = vsel %vm1231_vm6, 1.0, %v983_v2 }
  0x11   :  { %vm71_vm11 = vmand %vm39_vm5, %vm67_vm12  ;;  %vm331_vm3 = vcmask 1043456   ;;  %vm1776_vm5 = vcmp.lt.s32.totalorder %v1116_v10, 17 }
  0x12   :  { %vm72_vm0 = vmand %vm40_vm1, %vm68_vm9  ;;  %v1299_v13 = vsel %vm71_vm11, 1.0, %v983_v2  ;;  %vm100_vm11 = vcmp.le.s32.totalorder %v1126_v23, 14 }
  0x13   :  { %v1306_v17 = vsel %vm72_vm0, 1.0, %v983_v2  ;;  %vm1777_vm1 = vmmov %vm1776_vm5  ;;  %vm1757_vm0 = vcmp.lt.s32.totalorder %v1116_v10, 127 }
  0x14   :  { %149 = vrot.lane.b32.xlu1 %v1051_v6, %s986_s24  ;;  %147 = vrot.lane.b32.xlu0 %v1039_v4, %s986_s24  ;;  %vm1778_vm6 = vmmov %vm1777_vm1 }
  0x15   :  { %vm1779_vm14 = vmmov %vm1777_vm1 }
  0x18   :  { %153 = vrot.lane.b32.xlu1 %v1047_v5, %s986_s24  ;;  %151 = vrot.lane.b32.xlu0 %v1036_v3, %s986_s24 }
  0x1c   :  { %183 = vrot.lane.b32.xlu1 %v1051_v6, %s987_s25  ;;  %181 = vrot.lane.b32.xlu0 %v1039_v4, %s987_s25 }
  0x20   :  { %187 = vrot.lane.b32.xlu1 %v1047_v5, %s987_s25  ;;  %185 = vrot.lane.b32.xlu0 %v1036_v3, %s987_s25 }
  0x24   :  { %217 = vrot.lane.b32.xlu1 %v1051_v6, %s988_s26  ;;  %215 = vrot.lane.b32.xlu0 %v1039_v4, %s988_s26 }
  0x28   :  { %221 = vrot.lane.b32.xlu1 %v1047_v5, %s988_s26  ;;  %219 = vrot.lane.b32.xlu0 %v1036_v3, %s988_s26 }
  0x2c   :  { %251 = vrot.lane.b32.xlu1 %v1051_v6, %s989_s27  ;;  %249 = vrot.lane.b32.xlu0 %v1039_v4, %s989_s27 }
  0x30   :  { %255 = vrot.lane.b32.xlu1 %v1047_v5, %s989_s27  ;;  %253 = vrot.lane.b32.xlu0 %v1036_v3, %s989_s27 }
  0x34   :  { %234 = vrot.lane.b32.xlu1 %v1051_v6, %s990_s28  ;;  %232 = vrot.lane.b32.xlu0 %v1039_v4, %s990_s28 }
  0x38   :  { %238 = vrot.lane.b32.xlu1 %v1047_v5, %s990_s28  ;;  %236 = vrot.lane.b32.xlu0 %v1036_v3, %s990_s28 }
  0x3c   :  { %268 = vrot.lane.b32.xlu1 %v1051_v6, %s992_s29  ;;  %266 = vrot.lane.b32.xlu0 %v1039_v4, %s992_s29 }
  0x40   :  { %272 = vrot.lane.b32.xlu1 %v1047_v5, %s992_s29  ;;  %270 = vrot.lane.b32.xlu0 %v1036_v3, %s992_s29 }
  0x44   :  { %350 = vperm.xlu0 %979, %v135_v8  }
  0x76   :  { %v1118_v11 = vpop.permute.xlu1 %168  ;;  %v165_v12 = vpop.permute.xlu0 %164 }
  0x7a   :  { %v171_v18 = vpop.permute.xlu1 %170  ;;  %v167_v19 = vpop.permute.xlu0 %166 }
  0x7b   :  { %v173_v49 = vsel %vm1759_vm2, %v1118_v11, %v171_v18  ;;  %v176_v50 = vsel %vm1759_vm2, %v171_v18, %v165_v12  ;;  %v175_v54 = vsel %vm1759_vm2, %v165_v12, %v167_v19  ;;  %v174_v57 = vsel %vm1759_vm2, %v167_v19, %v1118_v11 }
  0x7c   :  { %v177_v62 = vmul.f32 %v1171_v36, %v176_v50  ;;  %v180_v63 = vmul.f32 %v1176_v37, %v173_v49  ;;  %v178_v9 = vmul.f32 %v1195_v40, %v175_v54  ;;  %v1296_v12 = vsel %vm1255_vm4, 1.0, %v983_v2 }
  0x7d   :  { %v179_v14 = vmul.f32 %v1200_v41, %v174_v57  ;;  %vm97_vm4 = vcmp.le.s32.totalorder %v1124_v22, 14 }
  0x7e   :  { %v201_v24 = vpop.permute.xlu1 %200  ;;  %v199_v25 = vpop.permute.xlu0 %198  ;;  %v287_v34 = vrot.slane %v177_v62, 4  ;;  %v290_v35 = vrot.slane %v180_v63, 4  ;;  %v288_v39 = vrot.slane %v178_v9, 4 }
  0x7f   :  { %v209_v55 = vsel %vm1758_vm7, %v199_v25, %v201_v24 }
  0x80   :  { %v212_v11 = vmul.f32 %v1205_v42, %v209_v55 }
  0x82   :  { %v205_v32 = vpop.permute.xlu1 %204  ;;  %v203_v33 = vpop.permute.xlu0 %202  ;;  %v300_v48 = vrot.slane %v212_v11, 4 }
  0x83   :  { %v210_v58 = vsel %vm1758_vm7, %v205_v32, %v199_v25  ;;  %v208_v7 = vsel %vm1758_vm7, %v201_v24, %v203_v33  ;;  %v207_v16 = vsel %vm1758_vm7, %v203_v33, %v205_v32  ;;  %vm1784_vm7 = vcmp.ge.s32.totalorder %v1134_v29, 1 }
  0x84   :  { %v211_v15 = vmul.f32 %v1181_v38, %v210_v58  ;;  %v213_v18 = vmul.f32 %v1215_v45, %v208_v7  ;;  %v214_v49 = vmul.f32 %v1220_v46, %v207_v16 }
  0x86   :  { %v150_v43 = vpop.permute.xlu1 %149  ;;  %v148_v44 = vpop.permute.xlu0 %147  ;;  %v299_v53 = vrot.slane %v211_v15, 4  ;;  %v301_v57 = vrot.slane %v213_v18, 4  ;;  %v302_v11 = vrot.slane %v214_v49, 4 }
  0x87   :  { %v158_v8 = vsel %vm1776_vm5, %v148_v44, %v150_v43  ;;  %vm257_vm5 = vcmp.lt.s32.totalorder %v1116_v10, 112 }
  0x88   :  { %v161_v19 = vmul.f32 %v1225_v47, %v158_v8 }
  0x8a   :  { %v154_v59 = vpop.permute.xlu1 %153  ;;  %v152_v60 = vpop.permute.xlu0 %151 }
  0x8b   :  { %v159_v20 = vsel %vm1777_vm1, %v154_v59, %v148_v44  ;;  %v156_v21 = vsel %vm1778_vm6, %v152_v60, %v154_v59  ;;  %v157_v32 = vsel %vm1779_vm14, %v150_v43, %v152_v60  ;;  %v289_v44 = vrot.slane %v179_v14, 4 }
  0x8c   :  { %v160_v54 = vmul.f32 %v1244_v51, %v159_v20  ;;  %v163_v55 = vmul.f32 %v1264_v56, %v156_v21  ;;  %v162_v58 = vmul.f32 %v1249_v52, %v157_v32  ;;  %v333_v60 = vsel %vm331_vm3, %v161_v19, %v288_v39 }
  0x8d   :  { %vm98_vm1 = vcmp.le.s32.totalorder %v1130_v27, 14  ;;  %vm99_vm6 = vcmp.le.s32.totalorder %v1132_v28, 14  ;;  %vm1781_vm14 = vcmp.ge.s32.totalorder %v1128_v26, 1 }
  0x8e   :  { %v184_v24 = vpop.permute.xlu1 %183  ;;  %v182_v25 = vpop.permute.xlu0 %181  ;;  %v332_v18 = vsel %vm331_vm3, %v160_v54, %v287_v34  ;;  %v335_v19 = vsel %vm331_vm3, %v163_v55, %v290_v35  ;;  %v1357_v55 = vsel %vm66_vm13, 1.0, %v983_v2  ;;  %vm102_vm2 = vmand %vm98_vm1, %vm1784_vm7  ;;  %vm274_vm7 = vcmp.lt.s32.totalorder %v1116_v10, 111 }
  0x8f   :  { %v192_v33 = vsel %vm1756_vm8, %v182_v25, %v184_v24 }
  0x90   :  { %v195_v50 = vmul.f32 %v1279_v61, %v192_v33 }
  0x92   :  { %v188_v59 = vpop.permute.xlu1 %187  ;;  %v186_v43 = vpop.permute.xlu0 %185  ;;  %v337_v62 = vsel %vm331_vm3, %v195_v50, %v300_v48 }
  0x93   :  { %v193_v63 = vsel %vm1756_vm8, %v188_v59, %v182_v25  ;;  %v190_v7 = vsel %vm1756_vm8, %v186_v43, %v188_v59  ;;  %v191_v8 = vsel %vm1756_vm8, %v184_v24, %v186_v43  ;;  %v937_v9 = vpack.c.bf16 %v337_v62, %v333_v60  ;;  %vm101_vm8 = vmand %vm97_vm4, %vm1781_vm14 }
  0x94   :  { %v194_v14 = vmul.f32 %v1296_v12, %v193_v63  ;;  %v196_v15 = vmul.f32 %v1299_v13, %v191_v8  ;;  %v197_v16 = vmul.f32 %v1306_v17, %v190_v7  ;;  %v334_v24 = vsel %vm331_vm3, %v162_v58, %v289_v44 }
  0x95   :  { %938 = vmatprep.subr.bf16.mxu0 %v937_v9  ;;  %v1345_v44 = vsel %vm65_vm15, 1.0, %v983_v2  ;;  %v1373_v43 = vsel %vm97_vm4, 1.0, %v983_v2  ;;  %v1378_v60 = vsel %vm100_vm11, 1.0, %v983_v2  ;;  %vm240_vm14 = vcmp.lt.s32.totalorder %v1116_v10, 113 }
  0x96   :  { %v218_v20 = vpop.permute.xlu1 %217  ;;  %v216_v21 = vpop.permute.xlu0 %215  ;;  %v336_v25 = vsel %vm331_vm3, %v194_v14, %v299_v53  ;;  %v339_v32 = vsel %vm331_vm3, %v197_v16, %v302_v11  ;;  %v338_v33 = vsel %vm331_vm3, %v196_v15, %v301_v57  ;;  %v1351_v53 = vsel %vm68_vm9, 1.0, %v983_v2  ;;  %1780 = vst [vmem:[#allocation4_spill] sm:$0xff] %v1378_v60 }
  0x97   :  { %v939_v39 = vpack.c.bf16 %v336_v25, %v332_v18  ;;  %v945_v48 = vpack.c.bf16 %v339_v32, %v335_v19  ;;  %v947_v49 = vpack.c.bf16 %v338_v33, %v334_v24  ;;  %v1362_v57 = vsel %vm67_vm12, 1.0, %v983_v2 }
  0x98   :  { %v226_v7 = vsel %vm1757_vm0, %v216_v21, %v218_v20  ;;  %v1395_v14 = vsel %vm98_vm1, 1.0, %v983_v2  ;;  %v1400_v15 = vsel %vm99_vm6, 1.0, %v983_v2  ;;  %v1418_v25 = vsel %vm101_vm8, 1.0, %v983_v2 }
  0x99   :  { %940 = vmatpush1.bf16.msra.mxu0 %v939_v39  ;;  %946 = vmatprep.subr.bf16.mxu1 %v945_v48  ;;  %v228_v32 = vmul.f32 %v1345_v44, %v226_v7 }
  0x9a   :  { %v222_v50 = vpop.permute.xlu1 %221  ;;  %948 = vmatpush1.bf16.msra.mxu1 %v947_v49  ;;  %v220_v34 = vpop.permute.xlu0 %219 }
  0x9b   :  { %v227_v58 = vsel %vm1757_vm0, %v222_v50, %v216_v21  ;;  %v225_v59 = vsel %vm1757_vm0, %v218_v20, %v220_v34  ;;  %v224_v8 = vsel %vm1757_vm0, %v220_v34, %v222_v50  ;;  %vm1409_vm0 = vmand %vm100_vm11, %vm44_vm10  ;;  %vm1785_vm10 = vcmp.ge.s32.totalorder %v1136_v30, 1 }
  0x9c   :  { %v231_v19 = vmul.f32 %v1351_v53, %v227_v58  ;;  %v229_v20 = vmul.f32 %v1357_v55, %v225_v59  ;;  %v230_v24 = vmul.f32 %v1362_v57, %v224_v8  ;;  %vm103_vm8 = vmand %vm99_vm6, %vm1785_vm10  ;;  %v1442_v58 = vsel %vm102_vm2, 1.0, %v983_v2 }
  0x9d   :  { %v1446_v7 = vsel %vm103_vm8, 1.0, %v983_v2  ;;  %v311_v8 = vrot.slane %v228_v32, 4  ;;  %vm1461_vm2 = vmand %vm100_vm11, %vm68_vm9  ;;  %vm1796_vm8 = vcmp.lt.s32.totalorder %v1116_v10, 17 }
  0x9e   :  { %v252_v54 = vpop.permute.xlu1 %251  ;;  %v250_v35 = vpop.permute.xlu0 %249  ;;  %v314_v59 = vrot.slane %v231_v19, 4  ;;  %vm123_vm9 = vmand %vm99_vm6, %vm67_vm12  ;;  %vm353_vm12 = vcmask 293888  }
  0x9f   :  { %v260_v9 = vsel %vm257_vm5, %v250_v35, %v252_v54  ;;  %v1505_v22 = vsel %vm123_vm9, 1.0, %v983_v2  ;;  %vm1799_vm9 = vmmov %vm1796_vm8 }
  0xa0   :  { %v262_v33 = vmul.f32 %v1373_v43, %v260_v9  ;;  %v313_v9 = vrot.slane %v230_v24, 4 }
  0xa2   :  { %v256_v62 = vpop.permute.xlu1 %255  ;;  %v254_v63 = vpop.permute.xlu0 %253 }
  0xa3   :  { %v261_v11 = vsel %vm257_vm5, %v256_v62, %v250_v35  ;;  %v259_v16 = vsel %vm257_vm5, %v252_v54, %v254_v63  ;;  %v258_v21 = vsel %vm257_vm5, %v254_v63, %v256_v62  ;;  %v1439_v35 = vsel %vm1409_vm0, 1.0, %v983_v2  ;;  %vm1475_vm0 = vmand %vm98_vm1, %vm66_vm13 }
  0xa4   :  { %v265_v39 = vmul.f32 %v1378_v60, %v261_v11  ;;  %v263_v50 = vmul.f32 %v1395_v14, %v259_v16  ;;  %v264_v54 = vmul.f32 %v1400_v15, %v258_v21  ;;  %v312_v62 = vrot.slane %v229_v20, 4  ;;  %vm121_vm13 = vmand %vm97_vm4, %vm65_vm15 }
  0xa5   :  { %v323_v11 = vrot.slane %v262_v33, 4  ;;  %v1502_v26 = vsel %vm1475_vm0, 1.0, %v983_v2  ;;  %v1508_v28 = vsel %vm121_vm13, 1.0, %v983_v2  ;;  %vm1790_vm15 = vcmp.lt.s32.totalorder %v1116_v10, 16  ;;  %vm1800_vm13 = vmmov %vm1796_vm8 }
  0xa6   :  { %v235_v48 = vpop.permute.xlu1 %234  ;;  %v233_v49 = vpop.permute.xlu0 %232  ;;  %v326_v16 = vrot.slane %v265_v39, 4  ;;  %v324_v1 = vrot.slane %v263_v50, 4  ;;  %v325_v20 = vrot.slane %v264_v54, 4  ;;  %v343_v39 = vsel %vm331_vm3, %v1047_v5, %v314_v59  ;;  %vm1792_vm11 = vmmov %vm1790_vm15 }
  0xa7   :  { %v243_v34 = vsel %vm240_vm14, %v233_v49, %v235_v48  ;;  %vm1791_vm4 = vcmp.lt.s32.totalorder %v1116_v10, 1  ;;  %vm1793_vm1 = vmmov %vm1792_vm11 }
  0xa8   :  { %v245_v63 = vmul.f32 %v1418_v25, %v243_v34  ;;  %vm1794_vm6 = vmmov %vm1791_vm4 }
  0xa9   :  { %vm1795_vm10 = vmmov %vm1793_vm1 }
  0xaa   :  { %v239_v21 = vpop.permute.xlu1 %238  ;;  %v237_v0 = vpop.permute.xlu0 %236 }
  0xab   :  { %v244_v18 = vsel %vm240_vm14, %v239_v21, %v233_v49  ;;  %v241_v60 = vsel %vm240_vm14, %v237_v0, %v239_v21  ;;  %v242_v19 = vsel %vm240_vm14, %v235_v48, %v237_v0  ;;  %v341_v0 = vsel %vm331_vm3, %v1051_v6, %v312_v62 }
  0xac   :  { %v248_v34 = vmul.f32 %v1439_v35, %v244_v18  ;;  %v246_v32 = vmul.f32 %v1442_v58, %v242_v19  ;;  %v247_v24 = vmul.f32 %v1446_v7, %v241_v60  ;;  %v344_v48 = vsel %vm331_vm3, %v245_v63, %v323_v11  ;;  %v133_v19 = vld [vmem:[%s1749_s1] sm:$0xf] }
  0xad   :  { %v342_v6 = vsel %vm331_vm3, %v1036_v3, %v313_v9  ;;  %v1497_v3 = vsel %vm1461_vm2, 1.0, %v983_v2  ;;  %vm1797_vm2 = vmmov %vm1791_vm4 }
  0xae   :  { %v269_v31 = vpop.permute.xlu1 %268  ;;  %v267_v60 = vpop.permute.xlu0 %266  ;;  %v345_v49 = vsel %vm331_vm3, %v246_v32, %v324_v1  ;;  %v347_v50 = vsel %vm331_vm3, %v248_v34, %v326_v16  ;;  %v346_v5 = vsel %vm331_vm3, %v247_v24, %v325_v20  ;;  %v340_v1 = vsel %vm331_vm3, %v1039_v4, %v311_v8  ;;  %vm1798_vm0 = vmmov %vm1797_vm2 }
  0xaf   :  { %v941_v27 = vpack.c.bf16 %v345_v49, %v341_v0  ;;  %v949_v29 = vpack.c.bf16 %v347_v50, %v343_v39  ;;  %v951_v54 = vpack.c.bf16 %v346_v5, %v342_v6  ;;  %v943_v59 = vpack.c.bf16 %v344_v48, %v340_v1  ;;  %v136_v50 = vld [vmem:[%s1750_s4] sm:$0xf] }
  0xb0   :  { %v277_v4 = vsel %vm274_vm7, %v267_v60, %v269_v31 }
  0xb1   :  { %942 = vmatprep.subr.bf16.mxu0 %v941_v27  ;;  %950 = vmatprep.subr.bf16.mxu1 %v949_v29  ;;  %v279_v18 = vmul.f32 %v1508_v28, %v277_v4 }
  0xb2   :  { %v273_v30 = vpop.permute.xlu1 %272  ;;  %944 = vmatpush1.bf16.msra.mxu0 %v943_v59  ;;  %952 = vmatpush1.bf16.msra.mxu1 %v951_v54  ;;  %v271_v62 = vpop.permute.xlu0 %270 }
  0xb3   :  { %v278_v63 = vsel %vm274_vm7, %v273_v30, %v267_v60  ;;  %v275_v8 = vsel %vm274_vm7, %v271_v62, %v273_v30  ;;  %v276_v9 = vsel %vm274_vm7, %v269_v31, %v271_v62 }
  0xb4   :  { %v282_v11 = vmul.f32 %v1497_v3, %v278_v63  ;;  %v280_v16 = vmul.f32 %v1502_v26, %v276_v9  ;;  %v281_v21 = vmul.f32 %v1505_v22, %v275_v8 }
  0xb6   :  { %925 = vmatprep.subr.msk.mxu0 %vm331_vm3, %v280_v16  ;;  %928 = vmatprep.subr.msk.mxu1 %vm331_vm3, %v282_v11 }
  0xb7   :  { %926 = vmatpush1.msk.msra.mxu0 %vm331_vm3, %v279_v18  ;;  %929 = vmatpush1.msk.msra.mxu1 %vm331_vm3, %v281_v21 }
  0xb8   :  { %927 = vmatmul.mubr.msk.f32.vlgmr.msra.gmra.mrb[0].mxu0 %vm353_vm12, %v133_v19  ;;  %930 = vmatmul.mubr.msk.f32.vlgmr.msra.gmra.mrb[0].mxu1 %vm353_vm12, %v133_v19 }
  0xb9   :  { %791 = vmatprep.mubr.f32.mxu0 %v983_v2  ;;  %862 = vmatprep.mubr.f32.mxu1 %v983_v2 }
  0xc3   :  { %v351_v20 = vpop.permute.xlu0 %350 }
 0x18b   :  { %v435_v34 = vpop.f32.mrb[0].mxu0  ;;  %v506_v32 = vpop.f32.mrb[0].mxu1 }
 0x18c   :  { %v436_v24 = vadd.f32 %v435_v34, %v351_v20  ;;  %v507_v33 = vadd.f32 %v506_v32, %v351_v20  ;;  %v437_v0 = vpop.f32.mrb[1].mxu0  ;;  %v508_v39 = vpop.f32.mrb[1].mxu1 }
 0x18d   :  { %v438_v31 = vadd.f32 %v437_v0, %v351_v20  ;;  %v509_v2 = vadd.f32 %v508_v39, %v351_v20 }
 0x18e   :  { %v1533_v48 = vmax.f32 %v436_v24, 0.0  ;;  %v1535_v23 = vmax.f32 %v507_v33, 0.0 }
 0x18f   :  { %v1541_v60 = vmax.f32 %v438_v31, 0.0  ;;  %v1547_v49 = vmax.f32 %v509_v2, 0.0 }
 0x190   :  { %535 = vrot.lane.b32.xlu0 %v1535_v23, %s984_s22  ;;  %531 = vrot.lane.b32.xlu1 %v1533_v48, %s984_s22 }
 0x194   :  { %563 = vrot.lane.b32.xlu0 %v1533_v48, %s985_s23  ;;  %533 = vrot.lane.b32.xlu1 %v1541_v60, %s984_s22 }
 0x198   :  { %567 = vrot.lane.b32.xlu0 %v1535_v23, %s985_s23  ;;  %537 = vrot.lane.b32.xlu1 %v1547_v49, %s984_s22 }
 0x19c   :  { %515 = vrot.lane.b32.xlu0 %v1533_v48, %s986_s24  ;;  %565 = vrot.lane.b32.xlu1 %v1541_v60, %s985_s23 }
 0x1a0   :  { %519 = vrot.lane.b32.xlu0 %v1535_v23, %s986_s24  ;;  %569 = vrot.lane.b32.xlu1 %v1547_v49, %s985_s23 }
 0x1a4   :  { %547 = vrot.lane.b32.xlu0 %v1533_v48, %s987_s25  ;;  %517 = vrot.lane.b32.xlu1 %v1541_v60, %s986_s24 }
 0x1a8   :  { %551 = vrot.lane.b32.xlu0 %v1535_v23, %s987_s25  ;;  %521 = vrot.lane.b32.xlu1 %v1547_v49, %s986_s24 }
 0x1ac   :  { %579 = vrot.lane.b32.xlu0 %v1533_v48, %s988_s26  ;;  %549 = vrot.lane.b32.xlu1 %v1541_v60, %s987_s25 }
 0x1b0   :  { %583 = vrot.lane.b32.xlu0 %v1535_v23, %s988_s26  ;;  %553 = vrot.lane.b32.xlu1 %v1547_v49, %s987_s25 }
 0x1b4   :  { %611 = vrot.lane.b32.xlu0 %v1533_v48, %s989_s27  ;;  %581 = vrot.lane.b32.xlu1 %v1541_v60, %s988_s26 }
 0x1b8   :  { %615 = vrot.lane.b32.xlu0 %v1535_v23, %s989_s27  ;;  %585 = vrot.lane.b32.xlu1 %v1547_v49, %s988_s26 }
 0x1bc   :  { %595 = vrot.lane.b32.xlu0 %v1533_v48, %s990_s28  ;;  %613 = vrot.lane.b32.xlu1 %v1541_v60, %s989_s27 }
 0x1c0   :  { %599 = vrot.lane.b32.xlu0 %v1535_v23, %s990_s28  ;;  %617 = vrot.lane.b32.xlu1 %v1547_v49, %s989_s27 }
 0x1c4   :  { %627 = vrot.lane.b32.xlu0 %v1533_v48, %s992_s29  ;;  %597 = vrot.lane.b32.xlu1 %v1541_v60, %s990_s28 }
 0x1c8   :  { %631 = vrot.lane.b32.xlu0 %v1535_v23, %s992_s29  ;;  %601 = vrot.lane.b32.xlu1 %v1547_v49, %s990_s28 }
 0x1cc   :  { %709 = vperm.xlu0 %979, %v136_v50   ;;  %629 = vrot.lane.b32.xlu1 %v1541_v60, %s992_s29 }
 0x1d0   :  { %633 = vrot.lane.b32.xlu1 %v1547_v49, %s992_s29 }
 0x202   :  { %v536_v6 = vpop.permute.xlu0 %535  ;;  %v532_v5 = vpop.permute.xlu1 %531 }
 0x206   :  { %v564_v27 = vpop.permute.xlu0 %563  ;;  %v534_v29 = vpop.permute.xlu1 %533 }
 0x207   :  { %v541_v9 = vsel %vm1790_vm15, %v532_v5, %v534_v29  ;;  %v540_v24 = vsel %vm1795_vm10, %v534_v29, %v536_v6  ;;  %vm1801_vm15 = vcmp.lt.s32.totalorder %v1116_v10, 15  ;;  %vm1806_vm10 = vcmp.lt.s32.totalorder %v1116_v10, 127 }
 0x208   :  { %v544_v21 = vmul.f32 %v1195_v40, %v541_v9  ;;  %v545_v2 = vmul.f32 %v1200_v41, %v540_v24 }
 0x20a   :  { %v568_v1 = vpop.permute.xlu0 %567  ;;  %v538_v54 = vpop.permute.xlu1 %537  ;;  %v648_v50 = vrot.slane %v544_v21, 4  ;;  %v649_v24 = vrot.slane %v545_v2, 4 }
 0x20b   :  { %v542_v16 = vsel %vm1792_vm11, %v538_v54, %v532_v5  ;;  %v539_v18 = vsel %vm1793_vm1, %v536_v6, %v538_v54  ;;  %vm1803_vm11 = vmmov %vm1796_vm8 }
 0x20c   :  { %v543_v0 = vmul.f32 %v1171_v36, %v542_v16  ;;  %v546_v40 = vmul.f32 %v1176_v37, %v539_v18 }
 0x20e   :  { %v516_v59 = vpop.permute.xlu0 %515  ;;  %v566_v4 = vpop.permute.xlu1 %565  ;;  %v650_v9 = vrot.slane %v546_v40, 4 }
 0x20f   :  { %v573_v11 = vsel %vm1791_vm4, %v564_v27, %v566_v4  ;;  %v572_v19 = vsel %vm1794_vm6, %v566_v4, %v568_v1  ;;  %vm1802_vm4 = vmmov %vm1801_vm15 }
 0x210   :  { %v576_v20 = vmul.f32 %v1205_v42, %v573_v11  ;;  %v577_v39 = vmul.f32 %v1215_v45, %v572_v19  ;;  %vm1804_vm1 = vmmov %vm1802_vm4 }
 0x211   :  { %vm1805_vm6 = vmmov %vm1804_vm1 }
 0x212   :  { %v520_v30 = vpop.permute.xlu0 %519  ;;  %v570_v62 = vpop.permute.xlu1 %569  ;;  %v660_v5 = vrot.slane %v576_v20, 4  ;;  %v661_v11 = vrot.slane %v577_v39, 4 }
 0x213   :  { %v571_v31 = vsel %vm1797_vm2, %v568_v1, %v570_v62  ;;  %v574_v42 = vsel %vm1798_vm0, %v570_v62, %v564_v27  ;;  %v647_v62 = vrot.slane %v543_v0, 4 }
 0x214   :  { %v575_v41 = vmul.f32 %v1181_v38, %v574_v42  ;;  %v578_v1 = vmul.f32 %v1220_v46, %v571_v31 }
 0x216   :  { %v548_v63 = vpop.permute.xlu0 %547  ;;  %v518_v8 = vpop.permute.xlu1 %517 }
 0x217   :  { %v525_v33 = vsel %vm1796_vm8, %v516_v59, %v518_v8  ;;  %vm1807_vm8 = vmmov %vm1806_vm10 }
 0x218   :  { %v528_v6 = vmul.f32 %v1225_v47, %v525_v33  ;;  %v524_v47 = vsel %vm1803_vm11, %v518_v8, %v520_v30  ;;  %vm1808_vm2 = vmmov %vm1807_vm8 }
 0x219   :  { %v529_v20 = vmul.f32 %v1249_v52, %v524_v47  ;;  %vm1809_vm0 = vmmov %vm1808_vm2 }
 0x21a   :  { %v552_v34 = vpop.permute.xlu0 %551  ;;  %v522_v32 = vpop.permute.xlu1 %521  ;;  %v692_v38 = vsel %vm331_vm3, %v528_v6, %v648_v50 }
 0x21b   :  { %v523_v36 = vsel %vm1799_vm9, %v520_v30, %v522_v32  ;;  %v526_v37 = vsel %vm1800_vm13, %v522_v32, %v516_v59  ;;  %v662_v32 = vrot.slane %v578_v1, 4  ;;  %v693_v31 = vsel %vm331_vm3, %v529_v20, %v649_v24  ;;  %v1810_v20 = vld [vmem:[#allocation4_spill] sm:$0xff] }
 0x21c   :  { %v527_v16 = vmul.f32 %v1244_v51, %v526_v37  ;;  %v530_v21 = vmul.f32 %v1264_v56, %v523_v36 }
 0x21e   :  { %v580_v29 = vpop.permute.xlu0 %579  ;;  %v550_v54 = vpop.permute.xlu1 %549  ;;  %v691_v0 = vsel %vm331_vm3, %v527_v16, %v647_v62  ;;  %v694_v39 = vsel %vm331_vm3, %v530_v21, %v650_v9 }
 0x21f   :  { %v556_v45 = vsel %vm1801_vm15, %v550_v54, %v552_v34  ;;  %v557_v27 = vsel %vm1802_vm4, %v548_v63, %v550_v54 }
 0x220   :  { %v560_v4 = vmul.f32 %v1279_v61, %v557_v27  ;;  %v561_v59 = vmul.f32 %v1299_v13, %v556_v45  ;;  %v659_v13 = vrot.slane %v575_v41, 4 }
 0x222   :  { %v584_v18 = vpop.permute.xlu0 %583  ;;  %v554_v19 = vpop.permute.xlu1 %553  ;;  %v696_v46 = vsel %vm331_vm3, %v560_v4, %v660_v5  ;;  %v697_v33 = vsel %vm331_vm3, %v561_v59, %v661_v11 }
 0x223   :  { %v555_v61 = vsel %vm1804_vm1, %v552_v34, %v554_v19  ;;  %v558_v30 = vsel %vm1805_vm6, %v554_v19, %v548_v63  ;;  %v953_v8 = vpack.c.bf16 %v696_v46, %v692_v38  ;;  %v963_v50 = vpack.c.bf16 %v697_v33, %v693_v31 }
 0x224   :  { %v559_v51 = vmul.f32 %v1296_v12, %v558_v30  ;;  %v562_v56 = vmul.f32 %v1306_v17, %v555_v61 }
 0x225   :  { %954 = vmatprep.subr.bf16.mxu0 %v953_v8 }
 0x226   :  { %v695_v52 = vsel %vm331_vm3, %v559_v51, %v659_v13  ;;  %v612_v40 = vpop.permute.xlu0 %611  ;;  %v582_v34 = vpop.permute.xlu1 %581  ;;  %v698_v63 = vsel %vm331_vm3, %v562_v56, %v662_v32 }
 0x227   :  { %v955_v42 = vpack.c.bf16 %v695_v52, %v691_v0  ;;  %v961_v12 = vpack.c.bf16 %v698_v63, %v694_v39  ;;  %v588_v5 = vsel %vm1806_vm10, %v582_v34, %v584_v18  ;;  %v589_v6 = vsel %vm1807_vm8, %v580_v29, %v582_v34 }
 0x228   :  { %v591_v27 = vmul.f32 %v1345_v44, %v589_v6  ;;  %v592_v41 = vmul.f32 %v1357_v55, %v588_v5  ;;  %v134_v5 = vld [vmem:[%s1751_s3] sm:$0xf] }
 0x229   :  { %956 = vmatpush1.bf16.msra.mxu0 %v955_v42  ;;  %962 = vmatprep.subr.bf16.mxu1 %v961_v12 }
 0x22a   :  { %v616_v17 = vpop.permute.xlu0 %615  ;;  %964 = vmatpush1.bf16.msra.mxu1 %v963_v50  ;;  %v586_v2 = vpop.permute.xlu1 %585  ;;  %v671_v59 = vrot.slane %v591_v27, 4  ;;  %v672_v16 = vrot.slane %v592_v41, 4 }
 0x22b   :  { %v587_v4 = vsel %vm1808_vm2, %v584_v18, %v586_v2  ;;  %v590_v62 = vsel %vm1809_vm0, %v586_v2, %v580_v29 }
 0x22c   :  { %v593_v55 = vmul.f32 %v1362_v57, %v587_v4  ;;  %v594_v19 = vmul.f32 %v1351_v53, %v590_v62  ;;  %v699_v53 = vsel %vm331_vm3, %v1533_v48, %v671_v59  ;;  %v700_v13 = vsel %vm331_vm3, %v1541_v60, %v672_v16  ;;  %v1812_v4 = vld [vmem:[#allocation2_spill] sm:$0xff] }
 0x22d   :  { %v872_v62 = vcombine.high %v1812_v4, %v1812_v4 }
 0x22e   :  { %v596_v54 = vpop.permute.xlu0 %595  ;;  %v614_v36 = vpop.permute.xlu1 %613  ;;  %v673_v32 = vrot.slane %v593_v55, 4  ;;  %v674_v51 = vrot.slane %v594_v19, 4 }
 0x22f   :  { %v620_v37 = vsel %vm257_vm5, %v614_v36, %v616_v17  ;;  %v621_v45 = vsel %vm257_vm5, %v612_v40, %v614_v36 }
 0x230   :  { %v623_v9 = vmul.f32 %v1373_v43, %v621_v45  ;;  %v624_v11 = vmul.f32 %v1395_v14, %v620_v37  ;;  %v701_v34 = vsel %vm331_vm3, %v1535_v23, %v673_v32  ;;  %v702_v42 = vsel %vm331_vm3, %v1547_v49, %v674_v51  ;;  %v1811_v45 = vld [vmem:[#allocation3_spill] sm:$0xff] }
 0x231   :  { %v871_v10 = vcombine.high %v1811_v45, %v1811_v45 }
 0x232   :  { %v600_v1 = vpop.permute.xlu0 %599  ;;  %v618_v47 = vpop.permute.xlu1 %617  ;;  %v683_v38 = vrot.slane %v623_v9, 4  ;;  %v684_v46 = vrot.slane %v624_v11, 4 }
 0x233   :  { %v619_v21 = vsel %vm257_vm5, %v616_v17, %v618_v47  ;;  %v622_v44 = vsel %vm257_vm5, %v618_v47, %v612_v40 }
 0x234   :  { %v625_v29 = vmul.f32 %v1400_v15, %v619_v21  ;;  %v626_v61 = vmul.f32 %v1810_v20, %v622_v44  ;;  %v982_v21 = vld [vmem:[%s1747_s0 + $0x8] sm:$0xff] }
 0x236   :  { %v598_v18 = vpop.permute.xlu1 %597  ;;  %v628_v30 = vpop.permute.xlu0 %627  ;;  %v685_v52 = vrot.slane %v625_v29, 4  ;;  %v686_v48 = vrot.slane %v626_v61, 4 }
 0x237   :  { %v604_v43 = vsel %vm240_vm14, %v598_v18, %v600_v1  ;;  %v605_v14 = vsel %vm240_vm14, %v596_v54, %v598_v18 }
 0x238   :  { %v607_v8 = vmul.f32 %v1418_v25, %v605_v14  ;;  %v608_v57 = vmul.f32 %v1442_v58, %v604_v43 }
 0x23a   :  { %v703_v56 = vsel %vm331_vm3, %v607_v8, %v683_v38  ;;  %v602_v24 = vpop.permute.xlu1 %601  ;;  %v704_v15 = vsel %vm331_vm3, %v608_v57, %v684_v46  ;;  %v632_v39 = vpop.permute.xlu0 %631 }
 0x23b   :  { %v603_v33 = vsel %vm240_vm14, %v600_v1, %v602_v24  ;;  %v606_v25 = vsel %vm240_vm14, %v602_v24, %v596_v54  ;;  %v957_v58 = vpack.c.bf16 %v704_v15, %v700_v13  ;;  %v959_v0 = vpack.c.bf16 %v703_v56, %v699_v53 }
 0x23c   :  { %v609_v40 = vmul.f32 %v1446_v7, %v603_v33  ;;  %v610_v60 = vmul.f32 %v1439_v35, %v606_v25 }
 0x23d   :  { %958 = vmatprep.subr.bf16.mxu0 %v957_v58 }
 0x23e   :  { %v705_v63 = vsel %vm331_vm3, %v609_v40, %v685_v52  ;;  %960 = vmatpush1.bf16.msra.mxu0 %v959_v0  ;;  %v630_v31 = vpop.permute.xlu1 %629  ;;  %v706_v12 = vsel %vm331_vm3, %v610_v60, %v686_v48 }
 0x23f   :  { %v636_v50 = vsel %vm274_vm7, %v630_v31, %v632_v39  ;;  %v637_v35 = vsel %vm274_vm7, %v628_v30, %v630_v31  ;;  %v965_v7 = vpack.c.bf16 %v706_v12, %v702_v42  ;;  %v967_v17 = vpack.c.bf16 %v705_v63, %v701_v34 }
 0x240   :  { %v639_v23 = vmul.f32 %v1508_v28, %v637_v35  ;;  %v640_v2 = vmul.f32 %v1502_v26, %v636_v50 }
 0x241   :  { %966 = vmatprep.subr.bf16.mxu1 %v965_v7 }
 0x242   :  { %931 = vmatprep.subr.msk.mxu0 %vm331_vm3, %v640_v2  ;;  %968 = vmatpush1.bf16.msra.mxu1 %v967_v17  ;;  %v634_v49 = vpop.permute.xlu1 %633 }
 0x243   :  { %v635_v6 = vsel %vm274_vm7, %v632_v39, %v634_v49  ;;  %v638_v54 = vsel %vm274_vm7, %v634_v49, %v628_v30  ;;  %932 = vmatpush1.msk.msra.mxu0 %vm331_vm3, %v639_v23 }
 0x244   :  { %v641_v28 = vmul.f32 %v1505_v22, %v635_v6  ;;  %v642_v26 = vmul.f32 %v1497_v3, %v638_v54  ;;  %933 = vmatmul.mubr.msk.f32.vlgmr.msra.gmra.mrb[2].mxu0 %vm353_vm12, %v134_v5 }
 0x246   :  { %934 = vmatprep.subr.msk.mxu1 %vm331_vm3, %v642_v26 }
 0x247   :  { %935 = vmatpush1.msk.msra.mxu1 %vm331_vm3, %v641_v28 }
 0x248   :  { %936 = vmatmul.mubr.msk.f32.vlgmr.msra.gmra.mrb[2].mxu1 %vm353_vm12, %v134_v5 }
 0x24b   :  { %v710_v36 = vpop.permute.xlu0 %709 }
 0x317   :  { %v793_v37 = vpop.f32.mrb[2].mxu0 }
 0x318   :  { %v794_v27 = vadd.f32 %v793_v37, %v710_v36  ;;  %v795_v41 = vpop.f32.mrb[3].mxu0 }
 0x319   :  { %v796_v1 = vadd.f32 %v795_v41, %v710_v36 }
 0x31a   :  { %v875_v22 = vadd.f32 %v794_v27, %v1811_v45 }
 0x31b   :  { %v876_v47 = vadd.f32 %v871_v10, %v796_v1  ;;  %v864_v3 = vpop.f32.mrb[2].mxu1 }
 0x31c   :  { %v865_v9 = vadd.f32 %v864_v3, %v710_v36  ;;  %v866_v11 = vpop.f32.mrb[3].mxu1 }
 0x31d   :  { %v883_v59 = vcombine.low %v875_v22, %v876_v47  ;;  %v867_v16 = vadd.f32 %v866_v11, %v710_v36 }
 0x31e   :  { %v877_v44 = vadd.f32 %v982_v21, %v865_v9 }
 0x31f   :  { %887 = vst [vmem:[%s1752_s5] sm:$0xff] %v883_v59  ;;  %v878_v55 = vadd.f32 %v872_v62, %v867_v16 }
 0x321   :  { %v884_v19 = vcombine.low %v877_v44, %v878_v55 }
 0x323   :  { %888 = vst [vmem:[%s1752_s5 + $0x8] sm:$0xff] %v884_v19 }

</bundles_post_ra>
